<compile_context>
chip_gen: v7x
topology: tpu7x:2x2x1
jax: 0.10.0
libtpu: 0.0.40
codegen_flags: <defaults>
</compile_context>

<pallas_src>
import functools

import jax
import jax.numpy as jnp
from jax.experimental import pallas as pl
from jax.experimental.pallas import tpu as pltpu


def _mlp_kernel(x_ref, w1_ref, b1_ref, w2_ref, b2_ref, w3_ref, b3_ref, o_ref):
    # x arrives as f32; cast to bf16 in-kernel (removes a wrapper-side HBM pass).
    x = x_ref[...].astype(jnp.bfloat16)

    # Linear(D_in -> H1): bf16 MXU operands, f32 accumulate; ReLU in f32 (VPU).
    h = jnp.dot(x, w1_ref[...], preferred_element_type=jnp.float32) + b1_ref[...]
    h = jnp.maximum(h, 0.0)

    # Linear(H1 -> H2): bf16 MXU operands, f32 accumulate; tanh in f32 (EUP).
    h = jnp.dot(h.astype(jnp.bfloat16), w2_ref[...],
                preferred_element_type=jnp.float32) + b2_ref[...]
    h = jnp.tanh(h)

    # LayerNorm (eps=1e-5), one-pass stats: var = E[h^2] - E[h]^2.  h is
    # tanh-bounded so the cancellation is benign.  The elementwise affine
    # (gamma, beta) is folded into the classifier in prepare_params().
    mean = jnp.mean(h, axis=-1, keepdims=True)
    msq = jnp.mean(h * h, axis=-1, keepdims=True)
    var = msq - mean * mean
    h = (h - mean) * jax.lax.rsqrt(var + 1e-5)

    # Classifier (LN affine pre-folded).  Output block is (TB, num_classes):
    # masked stores, but far fewer HBM write bytes than a 128-padded output.
    out = jnp.dot(h.astype(jnp.bfloat16), w3_ref[...],
                  preferred_element_type=jnp.float32) + b3_ref[...]
    o_ref[...] = out.astype(o_ref.dtype)


def prepare_params(params):
    """One-time prep (hoisted out of the forward): bf16 MXU weights + LayerNorm
    affine folded into the classifier.

    Exact in f32:  (h*gamma + beta) @ w3 + b3 = h @ (gamma.T * w3) + (beta @ w3 + b3).
    """
    w1, b1, w2, b2, gamma, beta, w3, b3 = params
    h2 = w3.shape[0]
    w3f = gamma.reshape(h2, 1) * w3
    b3f = b3.reshape(1, -1) + beta.reshape(1, h2) @ w3
    return (w1.astype(jnp.bfloat16), b1.reshape(1, -1).astype(jnp.float32),
            w2.astype(jnp.bfloat16), b2.reshape(1, -1).astype(jnp.float32),
            w3f.astype(jnp.bfloat16), b3f.astype(jnp.float32))


def _round_up(n, m):
    return ((n + m - 1) // m) * m


def _vmem_budget_bytes(tb, d_in, h1, h2, nc):
    """Rough resident + double-buffered working-set estimate (bytes)."""
    weights = 2 * (d_in * h1 + h1 * h2 + h2 * nc) * 2    # bf16, x2 buffers
    biases = 2 * (h1 + h2 + nc) * 4                      # f32, x2 buffers
    io_tiles = 2 * (tb * d_in * 4 + tb * nc * 4)         # f32 in/out tiles, x2
    acts = 2 * tb * max(h1, h2) * 4                      # live f32 temporaries
    return weights + biases + io_tiles + acts


def fully_connected_forward(x, prepared_params, *, batch_tile=1024):
    """x: (B, ...) -> flattened to (B, input_size); returns (B, num_classes) f32."""
    w1, b1, w2, b2, w3, b3 = prepared_params
    B = x.shape[0]
    x2d = x.reshape(B, -1).astype(jnp.float32)
    d_in = x2d.shape[1]
    h1, h2 = w1.shape[1], w2.shape[1]
    num_classes = w3.shape[1]
    assert w1.shape[0] == d_in, (w1.shape, d_in)

    # Batch tile: multiple of 16 (bf16 sublane packing).  Sized so the grid has
    # >= 2 steps whenever B > 16, letting v7x's two TensorCores split the
    # "parallel" batch axis; large batches use the full batch_tile (fewer,
    # fatter grid steps -> per-step overhead amortized, MXU fuller in M).
    tb = min(batch_tile, max(16, _round_up(pl.cdiv(B, 2), 16)))
    num_tiles = pl.cdiv(B, tb)
    # No explicit batch padding: Pallas handles the ragged last block (OOB rows
    # are computed on garbage but the corresponding output rows are masked).

    def resident_spec(a):
        nd = a.ndim
        return pl.BlockSpec(a.shape, lambda i, _nd=nd: (0,) * _nd)

    vmem_bytes = min(64 * 1024 * 1024,
                     max(4 * 1024 * 1024,
                         2 * _vmem_budget_bytes(tb, d_in, h1, h2, num_classes)))

    out = pl.pallas_call(
        _mlp_kernel,
        out_shape=jax.ShapeDtypeStruct((B, num_classes), jnp.float32),
        grid=(num_tiles,),
        in_specs=[pl.BlockSpec((tb, d_in), lambda i: (i, 0))]          # batch-tiled x
                 + [resident_spec(a) for a in prepared_params],        # resident params
        out_specs=pl.BlockSpec((tb, num_classes), lambda i: (i, 0)),
        compiler_params=pltpu.CompilerParams(
            dimension_semantics=("parallel",),      # megacore split on v7x
            vmem_limit_bytes=vmem_bytes,
        ),
    )(x2d, *prepared_params)

    return out


def init_params(key, input_size, h1, h2, num_classes):
    """PyTorch-Linear-style uniform(-1/sqrt(fan_in), 1/sqrt(fan_in)) init."""
    ks = jax.random.split(key, 8)

    def lin(kw, kb, fan_in, fan_out):
        bound = 1.0 / jnp.sqrt(fan_in)
        w = jax.random.uniform(kw, (fan_in, fan_out), jnp.float32, -bound, bound)
        b = jax.random.uniform(kb, (1, fan_out), jnp.float32, -bound, bound)
        return w, b

    w1, b1 = lin(ks[0], ks[1], input_size, h1)
    w2, b2 = lin(ks[2], ks[3], h1, h2)
    # PyTorch LayerNorm default init is gamma=1, beta=0; perturb here so the
    # LN-affine -> classifier fold is actually exercised by the check.
    gamma = 1.0 + 0.1 * jax.random.normal(ks[4], (1, h2), jnp.float32)
    beta = 0.1 * jax.random.normal(ks[5], (1, h2), jnp.float32)
    w3, b3 = lin(ks[6], ks[7], h2, num_classes)
    return (w1, b1, w2, b2, gamma, beta, w3, b3)


def ref_forward(x, params):
    """Pure-JAX reference: unfused LayerNorm affine, same bf16-operand recipe."""
    w1, b1, w2, b2, g, be, w3, b3 = params
    bf = jnp.bfloat16
    x2d = x.reshape(x.shape[0], -1).astype(jnp.float32)
    h = jnp.dot(x2d.astype(bf), w1.astype(bf),
                preferred_element_type=jnp.float32) + b1
    h = jnp.maximum(h, 0.0)
    h = jnp.dot(h.astype(bf), w2.astype(bf),
                preferred_element_type=jnp.float32) + b2
    h = jnp.tanh(h)
    m = h.mean(-1, keepdims=True)
    v = ((h - m) ** 2).mean(-1, keepdims=True)
    h = (h - m) * jax.lax.rsqrt(v + 1e-5) * g + be
    return jnp.dot(h.astype(bf), w3.astype(bf),
                   preferred_element_type=jnp.float32) + b3


if __name__ == "__main__":
    key = jax.random.PRNGKey(0)
    k_x, k_p = jax.random.split(key)

    # Small, module-consistent shapes: image-like input (B, 4, 4, 4) -> 64 features.
    B = 30
    input_size, h1, h2, num_classes = 64, 128, 128, 10

    x = jax.random.normal(k_x, (B, 4, 4, 4), jnp.float32)
    raw_params = init_params(k_p, input_size, h1, h2, num_classes)
    prepped = prepare_params(raw_params)   # one-time prep, hoisted out of forward

    # Small batch_tile here so the example exercises multiple grid steps and the
    # ragged last block (B=30 -> TB=16, grid=(2,), output rows 30..31 masked).
    fwd = jax.jit(functools.partial(fully_connected_forward, batch_tile=16))
    out = jax.block_until_ready(fwd(x, prepped))
    assert out.shape == (B, num_classes) and out.dtype == jnp.float32

    ref = ref_forward(x, raw_params)
    assert jnp.all(jnp.isfinite(out))
    err = float(jnp.max(jnp.abs(out - ref)))
    assert jnp.allclose(out, ref, atol=2e-2, rtol=2e-2), err

    print("KERNEL_OK")
</pallas_src>

<mosaic_0001>
module attributes {stable_mosaic.version = 11 : i64} {
  func.func @_mlp_kernel(%arg0: i32, %arg1: memref<16x64xf32, #tpu.memory_space<vmem>>, %arg2: memref<64x128xbf16, #tpu.memory_space<vmem>>, %arg3: memref<1x128xf32, #tpu.memory_space<vmem>>, %arg4: memref<128x128xbf16, #tpu.memory_space<vmem>>, %arg5: memref<1x128xf32, #tpu.memory_space<vmem>>, %arg6: memref<128x10xbf16, #tpu.memory_space<vmem>>, %arg7: memref<1x10xf32, #tpu.memory_space<vmem>>, %arg8: memref<16x10xf32, #tpu.memory_space<vmem>>) attributes {dimension_semantics = [#tpu.dimension_semantics<parallel>], iteration_bounds = array<i64: 2>, scalar_prefetch = 0 : i64, scratch_operands = 0 : i64, tpu.core_type = #tpu.core_type<tc>, window_params = [{transform_indices = @transform_0, window_bounds = array<i64: 16, 64>}, {pipeline_mode = #tpu.pipeline_mode<synchronous>, transform_indices = @transform_1, window_bounds = array<i64: 64, 128>}, {pipeline_mode = #tpu.pipeline_mode<synchronous>, transform_indices = @transform_2, window_bounds = array<i64: 1, 128>}, {pipeline_mode = #tpu.pipeline_mode<synchronous>, transform_indices = @transform_3, window_bounds = array<i64: 128, 128>}, {pipeline_mode = #tpu.pipeline_mode<synchronous>, transform_indices = @transform_4, window_bounds = array<i64: 1, 128>}, {pipeline_mode = #tpu.pipeline_mode<synchronous>, transform_indices = @transform_5, window_bounds = array<i64: 128, 10>}, {pipeline_mode = #tpu.pipeline_mode<synchronous>, transform_indices = @transform_6, window_bounds = array<i64: 1, 10>}, {transform_indices = @transform_7, window_bounds = array<i64: 16, 10>}]} {
    %c0 = arith.constant 0 : index
    %c0_0 = arith.constant 0 : index
    %0 = vector.load %arg1[%c0, %c0_0] : memref<16x64xf32, #tpu.memory_space<vmem>>, vector<16x64xf32>
    %1 = arith.truncf %0 : vector<16x64xf32> to vector<16x64xbf16>
    %c0_1 = arith.constant 0 : index
    %c0_2 = arith.constant 0 : index
    %2 = vector.load %arg2[%c0_1, %c0_2] : memref<64x128xbf16, #tpu.memory_space<vmem>>, vector<64x128xbf16>
    %cst = arith.constant dense<0.000000e+00> : vector<16x128xf32>
    %3 = tpu.matmul %1, %2, %cst {dimension_numbers = #tpu.dot_dimension_numbers<[1], [0], [0], [1], [0, 0, 1, 1], [], []>} : vector<16x64xbf16>, vector<64x128xbf16>, vector<16x128xf32> -> vector<16x128xf32>
    %c0_3 = arith.constant 0 : index
    %c0_4 = arith.constant 0 : index
    %4 = vector.load %arg3[%c0_3, %c0_4] : memref<1x128xf32, #tpu.memory_space<vmem>>, vector<1x128xf32>
    %5 = vector.broadcast %4 : vector<1x128xf32> to vector<16x128xf32>
    %6 = arith.addf %3, %5 : vector<16x128xf32>
    %cst_5 = arith.constant 0.000000e+00 : f32
    %7 = vector.broadcast %cst_5 : f32 to vector<16x128xf32>
    %8 = arith.maximumf %6, %7 : vector<16x128xf32>
    %9 = arith.truncf %8 : vector<16x128xf32> to vector<16x128xbf16>
    %c0_6 = arith.constant 0 : index
    %c0_7 = arith.constant 0 : index
    %10 = vector.load %arg4[%c0_6, %c0_7] : memref<128x128xbf16, #tpu.memory_space<vmem>>, vector<128x128xbf16>
    %cst_8 = arith.constant dense<0.000000e+00> : vector<16x128xf32>
    %11 = tpu.matmul %9, %10, %cst_8 {dimension_numbers = #tpu.dot_dimension_numbers<[1], [0], [0], [1], [0, 0, 1, 1], [], []>} : vector<16x128xbf16>, vector<128x128xbf16>, vector<16x128xf32> -> vector<16x128xf32>
    %c0_9 = arith.constant 0 : index
    %c0_10 = arith.constant 0 : index
    %12 = vector.load %arg5[%c0_9, %c0_10] : memref<1x128xf32, #tpu.memory_space<vmem>>, vector<1x128xf32>
    %13 = vector.broadcast %12 : vector<1x128xf32> to vector<16x128xf32>
    %14 = arith.addf %11, %13 : vector<16x128xf32>
    %15 = math.tanh %14 : vector<16x128xf32>
    %cst_11 = arith.constant dense<0.000000e+00> : vector<16xf32>
    %16 = vector.multi_reduction <add>, %15, %cst_11 [1] : vector<16x128xf32> to vector<16xf32>
    %17 = vector.shape_cast %16 : vector<16xf32> to vector<16x1xf32>
    %cst_12 = arith.constant 1.280000e+02 : f32
    %18 = vector.broadcast %cst_12 : f32 to vector<16x1xf32>
    %19 = arith.divf %17, %18 : vector<16x1xf32>
    %20 = arith.mulf %15, %15 : vector<16x128xf32>
    %cst_13 = arith.constant dense<0.000000e+00> : vector<16xf32>
    %21 = vector.multi_reduction <add>, %20, %cst_13 [1] : vector<16x128xf32> to vector<16xf32>
    %22 = vector.shape_cast %21 : vector<16xf32> to vector<16x1xf32>
    %cst_14 = arith.constant 1.280000e+02 : f32
    %23 = vector.broadcast %cst_14 : f32 to vector<16x1xf32>
    %24 = arith.divf %22, %23 : vector<16x1xf32>
    %25 = arith.mulf %19, %19 : vector<16x1xf32>
    %26 = arith.subf %24, %25 : vector<16x1xf32>
    %27 = vector.broadcast %19 : vector<16x1xf32> to vector<16x128xf32>
    %28 = arith.subf %15, %27 : vector<16x128xf32>
    %cst_15 = arith.constant 9.99999974E-6 : f32
    %29 = vector.broadcast %cst_15 : f32 to vector<16x1xf32>
    %30 = arith.addf %26, %29 : vector<16x1xf32>
    %31 = math.rsqrt %30 : vector<16x1xf32>
    %32 = vector.broadcast %31 : vector<16x1xf32> to vector<16x128xf32>
    %33 = arith.mulf %28, %32 : vector<16x128xf32>
    %34 = arith.truncf %33 : vector<16x128xf32> to vector<16x128xbf16>
    %c0_16 = arith.constant 0 : index
    %c0_17 = arith.constant 0 : index
    %35 = vector.load %arg6[%c0_16, %c0_17] : memref<128x10xbf16, #tpu.memory_space<vmem>>, vector<128x10xbf16>
    %cst_18 = arith.constant dense<0.000000e+00> : vector<16x10xf32>
    %36 = tpu.matmul %34, %35, %cst_18 {dimension_numbers = #tpu.dot_dimension_numbers<[1], [0], [0], [1], [0, 0, 1, 1], [], []>} : vector<16x128xbf16>, vector<128x10xbf16>, vector<16x10xf32> -> vector<16x10xf32>
    %c0_19 = arith.constant 0 : index
    %c0_20 = arith.constant 0 : index
    %37 = vector.load %arg7[%c0_19, %c0_20] : memref<1x10xf32, #tpu.memory_space<vmem>>, vector<1x10xf32>
    %38 = vector.broadcast %37 : vector<1x10xf32> to vector<16x10xf32>
    %39 = arith.addf %36, %38 : vector<16x10xf32>
    %c0_21 = arith.constant 0 : index
    %c0_22 = arith.constant 0 : index
    %40 = vector.load %arg8[%c0_21, %c0_22] : memref<16x10xf32, #tpu.memory_space<vmem>>, vector<16x10xf32>
    tpu.vector_store %arg8[%c0_21, %c0_22], %39 {strides = array<i32>} : memref<16x10xf32, #tpu.memory_space<vmem>>, vector<16x10xf32>,
    return
  }
  func.func @transform_0(%arg0: i32) -> (i32, i32) {
    %c0_i32 = arith.constant 0 : i32
    %c0_i32_0 = arith.constant 0 : i32
    return %arg0, %c0_i32 : i32, i32
  }
  func.func @transform_1(%arg0: i32) -> (i32, i32) {
    %c0_i32 = arith.constant 0 : i32
    %c0_i32_0 = arith.constant 0 : i32
    %c0_i32_1 = arith.constant 0 : i32
    return %c0_i32, %c0_i32_0 : i32, i32
  }
  func.func @transform_2(%arg0: i32) -> (i32, i32) {
    %c0_i32 = arith.constant 0 : i32
    %c0_i32_0 = arith.constant 0 : i32
    %c0_i32_1 = arith.constant 0 : i32
    return %c0_i32, %c0_i32_0 : i32, i32
  }
  func.func @transform_3(%arg0: i32) -> (i32, i32) {
    %c0_i32 = arith.constant 0 : i32
    %c0_i32_0 = arith.constant 0 : i32
    %c0_i32_1 = arith.constant 0 : i32
    return %c0_i32, %c0_i32_0 : i32, i32
  }
  func.func @transform_4(%arg0: i32) -> (i32, i32) {
    %c0_i32 = arith.constant 0 : i32
    %c0_i32_0 = arith.constant 0 : i32
    %c0_i32_1 = arith.constant 0 : i32
    return %c0_i32, %c0_i32_0 : i32, i32
  }
  func.func @transform_5(%arg0: i32) -> (i32, i32) {
    %c0_i32 = arith.constant 0 : i32
    %c0_i32_0 = arith.constant 0 : i32
    %c0_i32_1 = arith.constant 0 : i32
    return %c0_i32, %c0_i32_0 : i32, i32
  }
  func.func @transform_6(%arg0: i32) -> (i32, i32) {
    %c0_i32 = arith.constant 0 : i32
    %c0_i32_0 = arith.constant 0 : i32
    %c0_i32_1 = arith.constant 0 : i32
    return %c0_i32, %c0_i32_0 : i32, i32
  }
  func.func @transform_7(%arg0: i32) -> (i32, i32) {
    %c0_i32 = arith.constant 0 : i32
    %c0_i32_0 = arith.constant 0 : i32
    return %arg0, %c0_i32 : i32, i32
  }
}

</mosaic_0001>

<bundles_post_ra>
// kernel: fully_connected_forward.1
= control target key start
LH: loop header
LB: loop body
LE: loop exit
PB: predicated region body
PF: predicated region fallthrough
CT: control target
= control target key end

     0   :  { %s884_s24 = smov 0   ;;  %s1003_s0 = inlined_call_operand.vmem [shape: f32[30,64], index: 0, kind: input, shape index: {}]   ;;  %s1004_s1 = inlined_call_operand.vmem [shape: bf16[64,128], index: 1, kind: input, shape index: {}]   ;;  %s1005_s2 = inlined_call_operand.vmem [shape: f32[1,128], index: 2, kind: input, shape index: {}]   ;;  %s1006_s3 = inlined_call_operand.vmem [shape: bf16[128,128], index: 3, kind: input, shape index: {}]   ;;  %s1007_s4 = inlined_call_operand.vmem [shape: f32[1,128], index: 4, kind: input, shape index: {}]   ;;  %s1008_s5 = inlined_call_operand.vmem [shape: bf16[128,10], index: 5, kind: input, shape index: {}]   ;;  %s1009_s6 = inlined_call_operand.vmem [shape: f32[1,10], index: 6, kind: input, shape index: {}]   ;;  %s1010_s7 = inlined_call_operand.vmem [shape: f32[30,10], index: 7, kind: output, shape index: {}]  }
   0x1 LB: > { %s686_s25 = sadd.s32 4294967295, %s840_s24   ;;  %p690_p0 = scmp.ge.s32.totalorder %s840_s24, 1  ;;  %s840_s24 = sphi %s884_s24, %s17_s24  }
   0x2   : > { %p238_p1 = scmp.lt.s32.totalorder %s840_s24, 3 }
   0x4   : > { %p239_p2 = pnand %p690_p0, %p238_p1 }
   0x5   : > { %v806_v0 = vld [vmem:[%s1004_s1] sm:$0xff] (!%p239_p2)   ;;  %v842_v1 = vmov (!%p239_p2), 0.0   ;;  %v807_v2 = vld [vmem:[%s1004_s1 + $0x8] sm:$0xff] (!%p239_p2)   ;;  %vm843_vm0 = vmmov (!%p239_p2), 0   ;;  %s691_s30 = sshll.u32 (!%p239_p2), %s686_s25, 1  ;;  %v808_v4 = vld [vmem:[%s1004_s1 + $0x10] sm:$0xff] (!%p239_p2)  }
   0x6   : > { %242 = sbr.rel (%p239_p2) target bundleno = 853 (0x355), region = 48  ;;  %744 = vmatprep.subr.bf16.mxu0 (!%p239_p2), %v842_v1  ;;  %756 = vmatprep.subr.bf16.mxu1 (!%p239_p2), %v842_v1  ;;  %p271_p3 = scmp.lt.s32.totalorder (!%p239_p2), %s691_s30, 3  ;;  %v810_v3 = vld [vmem:[%s1006_s3] sm:$0xff] (!%p239_p2)   ;;  %v811_v5 = vld [vmem:[%s1006_s3 + $0x8] sm:$0xff] (!%p239_p2)   ;;  %v809_v6 = vld [vmem:[%s1004_s1 + $0x18] sm:$0xff] (!%p239_p2)   ;;  %vm325_vm1 = vcmask (!%p239_p2), 523264  }
   0x7   : > { %745 = vmatpush3.bf16.msra.mxu0 (!%p239_p2), %v806_v0  ;;  %752 = vmatprep.mubr.msk.bf16.mxu0 (!%p239_p2), %vm843_vm0, %v842_v1  ;;  %v812_v7 = vld [vmem:[%s1006_s3 + $0x10] sm:$0xff] (!%p239_p2)   ;;  %v813_v10 = vld [vmem:[%s1006_s3 + $0x18] sm:$0xff] (!%p239_p2)   ;;  %v814_v12 = vld [vmem:[%s1006_s3 + $0x20] sm:$0xff] (!%p239_p2)   ;;  %vm627_vm2 = vcmask (!%p239_p2), 80896  }
   0x8   : > { %746 = vmatprep.subr.bf16.mxu0 (!%p239_p2), %v842_v1  ;;  %772 = vmatprep.mubr.msk.bf16.mxu1 (!%p239_p2), %vm843_vm0, %v842_v1  ;;  %v815_v13 = vld [vmem:[%s1006_s3 + $0x28] sm:$0xff] (!%p239_p2)   ;;  %v816_v14 = vld [vmem:[%s1006_s3 + $0x30] sm:$0xff] (!%p239_p2)   ;;  %v817_v15 = vld [vmem:[%s1006_s3 + $0x38] sm:$0xff] (!%p239_p2)  }
   0x9   : > { %757 = vmatpush3.bf16.msra.mxu1 (!%p239_p2), %v810_v3  ;;  %v695_v16 = vld [vmem:[%s1005_s2] ss:$0 sm:$0xff] (!%p239_p2)  ;;  %v819_v38 = vld [vmem:[%s1008_s5 + $0x8] sm:$0xff] (!%p239_p2)   ;;  %v820_v39 = vld [vmem:[%s1008_s5 + $0x10] sm:$0xff] (!%p239_p2)  }
   0xa   : > { %758 = vmatprep.subr.bf16.mxu1 (!%p239_p2), %v842_v1  ;;  %v818_v26 = vld [vmem:[%s1008_s5] sm:$0xff] (!%p239_p2)   ;;  %v821_v40 = vld [vmem:[%s1008_s5 + $0x18] sm:$0xff] (!%p239_p2)   ;;  %v823_v42 = vld [vmem:[%s1008_s5 + $0x28] sm:$0xff] (!%p239_p2)  }
   0xb   : > { %747 = vmatpush3.bf16.msra.mxu0 (!%p239_p2), %v807_v2  ;;  %v701_v27 = vld [vmem:[%s1007_s4] ss:$0 sm:$0xff] (!%p239_p2)  ;;  %v824_v43 = vld [vmem:[%s1008_s5 + $0x30] sm:$0xff] (!%p239_p2)   ;;  %v825_v44 = vld [vmem:[%s1008_s5 + $0x38] sm:$0xff] (!%p239_p2)  }
   0xc   : > { %748 = vmatprep.subr.bf16.mxu0 (!%p239_p2), %v842_v1  ;;  %v822_v41 = vld [vmem:[%s1008_s5 + $0x20] sm:$0xff] (!%p239_p2)  }
   0xd   : > { %s1012_s30 = smov (!%p271_p3, %s691_s30), 3  ;;  %759 = vmatpush3.bf16.msra.mxu1 %v811_v5  ;;  %v710_v2 = vld [vmem:[%s1009_s6] ss:$0 sm:$0xff] }
   0xe   : > { %s692_s14 = sshll.u32 %s1012_s30, 3  ;;  %760 = vmatprep.subr.bf16.mxu1 %v842_v1 }
   0xf   : > { %s274_s17 = scalar_lea.vmem %s1003_s0, %s692_s14  ;;  %749 = vmatpush3.bf16.msra.mxu0 %v808_v4  ;;  %s280_s16 = scalar_lea.vmem %s1010_s7, %s692_s14 }
  0x10   : > { %v283_v8 = vld [vmem:[%s274_s17] sm:$0xff]  ;;  %v284_v9 = vld [vmem:[%s274_s17 + $0x8] sm:$0xff]  ;;  %750 = vmatprep.subr.bf16.mxu0 %v842_v1 }
  0x11   : > { %v285_v11 = vpack.c.bf16 %v284_v9, %v283_v8  ;;  %761 = vmatpush3.bf16.msra.mxu1 %v812_v7 }
  0x12   : > { %762 = vmatprep.subr.bf16.mxu1 %v842_v1 }
  0x13   : > { %751 = vmatpush3.bf16.msra.mxu0 %v809_v6 }
  0x14   : > { %776 = vmatprep.subr.bf16.mxu0 %v842_v1 }
  0x15   : > { %763 = vmatpush3.bf16.msra.mxu1 %v813_v10 }
  0x16   : > { %753 = vmatmul.mubr.msk.bf16.vlgmr.msra.gmra.mrb[0].mxu0 %vm325_vm1, %v285_v11  ;;  %764 = vmatprep.subr.bf16.mxu1 %v842_v1 }
  0x17   : > { %792 = vmatprep.mubr.msk.bf16.mxu0 %vm843_vm0, %v842_v1  ;;  %777 = vmatpush3.bf16.msra.mxu0 %v818_v26 }
  0x18   : > { %778 = vmatprep.subr.bf16.mxu0 %v842_v1 }
  0x19   : > { %765 = vmatpush3.bf16.msra.mxu1 %v814_v12 }
  0x1a   : > { %766 = vmatprep.subr.bf16.mxu1 %v842_v1 }
  0x1b   : > { %779 = vmatpush3.bf16.msra.mxu0 %v819_v38 }
  0x1c   : > { %780 = vmatprep.subr.bf16.mxu0 %v842_v1 }
  0x1d   : > { %767 = vmatpush3.bf16.msra.mxu1 %v815_v13 }
  0x1e   : > { %768 = vmatprep.subr.bf16.mxu1 %v842_v1 }
  0x1f   : > { %781 = vmatpush3.bf16.msra.mxu0 %v820_v39 }
  0x20   : > { %782 = vmatprep.subr.bf16.mxu0 %v842_v1 }
  0x21   : > { %769 = vmatpush3.bf16.msra.mxu1 %v816_v14 }
  0x22   : > { %770 = vmatprep.subr.bf16.mxu1 %v842_v1 }
  0x23   : > { %783 = vmatpush3.bf16.msra.mxu0 %v821_v40 }
  0x24   : > { %784 = vmatprep.subr.bf16.mxu0 %v842_v1 }
  0x25   : > { %771 = vmatpush3.bf16.msra.mxu1 %v817_v15 }
  0x27   : > { %785 = vmatpush3.bf16.msra.mxu0 %v822_v41 }
  0x28   : > { %786 = vmatprep.subr.bf16.mxu0 %v842_v1 }
  0x2b   : > { %787 = vmatpush3.bf16.msra.mxu0 %v823_v42 }
  0x2c   : > { %788 = vmatprep.subr.bf16.mxu0 %v842_v1 }
  0x2f   : > { %789 = vmatpush3.bf16.msra.mxu0 %v824_v43 }
  0x30   : > { %790 = vmatprep.subr.bf16.mxu0 %v842_v1 }
  0x33   : > { %791 = vmatpush3.bf16.msra.mxu0 %v825_v44 }
  0xe9   : > { %v363_v17 = vpop.f32.mrb[0].mxu0 }
  0xea   : > { %v364_v18 = vadd.f32 %v695_v16, %v363_v17  ;;  %v754_v19 = vpop.f32.mrb[1].mxu0 }
  0xeb   : > { %v366_v20 = vpop.f32.mrb[2].mxu0 }
  0xec   : > { %v367_v21 = vadd.f32 %v695_v16, %v366_v20  ;;  %v755_v22 = vpop.f32.mrb[3].mxu0  ;;  %v370_v23 = vmax.f32 %v364_v18, 0.0 }
  0xee   : > { %v371_v24 = vmax.f32 %v367_v21, 0.0 }
  0xf0   : > { %v372_v25 = vpack.c.bf16 %v371_v24, %v370_v23 }
  0xf2   : > { %773 = vmatmul.mubr.bf16.vlgmr.msra.gmra.mrb[0].mxu1 %v372_v25 }
 0x1c5   : > { %v478_v28 = vpop.f32.mrb[0].mxu1 }
 0x1c6   : > { %v479_v29 = vadd.f32 %v701_v27, %v478_v28  ;;  %v774_v30 = vpop.f32.mrb[1].mxu1 }
 0x1c7   : > { %v481_v31 = vpop.f32.mrb[2].mxu1 }
 0x1c8   : > { %826 = vtanh.f32 %v479_v29  ;;  %v482_v32 = vadd.f32 %v701_v27, %v481_v31  ;;  %v775_v33 = vpop.f32.mrb[3].mxu1 }
 0x1ca   : > { %828 = vtanh.f32 %v482_v32 }
 0x1d2   : > { %v827_v34 = vpop.eup %826 }
 0x1d3   : > { %487 = vadd.xlane.f32.xlu0 %v827_v34  ;;  %v494_v35 = vmul.f32 %v827_v34, %v827_v34 }
 0x1d4   : > { %v829_v36 = vpop.eup %828 }
 0x1d5   : > { %496 = vadd.xlane.f32.xlu1 %v494_v35  ;;  %v495_v37 = vmul.f32 %v829_v36, %v829_v36 }
 0x1d7   : > { %489 = vadd.xlane.f32.xlu0 %v829_v36 }
 0x1d9   : > { %498 = vadd.xlane.f32.xlu1 %v495_v37 }
 0x260   : > { %v488_v45 = vpop.xlane.xlu0 %487 }
 0x261   : > { %v492_v46 = vmul.f32 0.0078125, %v488_v45 }
 0x262   : > { %v497_v47 = vpop.xlane.xlu1 %496 }
 0x263   : > { %v502_v48 = vmul.f32 %v492_v46, %v492_v46  ;;  %v500_v49 = vmul.f32 0.0078125, %v497_v47  ;;  %v506_v60 = vsub.f32 %v827_v34, %v492_v46 }
 0x264   : > { %v490_v50 = vpop.xlane.xlu0 %489 }
 0x265   : > { %v504_v51 = vsub.f32 %v500_v49, %v502_v48  ;;  %v493_v52 = vmul.f32 0.0078125, %v490_v50 }
 0x266   : > { %v499_v53 = vpop.xlane.xlu1 %498 }
 0x267   : > { %v508_v54 = vadd.f32 1e-05, %v504_v51  ;;  %v503_v55 = vmul.f32 %v493_v52, %v493_v52  ;;  %v501_v56 = vmul.f32 0.0078125, %v499_v53  ;;  %v507_v61 = vsub.f32 %v829_v36, %v493_v52 }
 0x269   : > { %v505_v57 = vsub.f32 %v501_v56, %v503_v55  ;;  %830 = vrsqrt.f32 %v508_v54 }
 0x26b   : > { %v509_v58 = vadd.f32 1e-05, %v505_v57 }
 0x26d   : > { %832 = vrsqrt.f32 %v509_v58 }
 0x273   : > { %v831_v59 = vpop.eup %830 }
 0x274   : > { %v512_v63 = vmul.f32 %v831_v59, %v506_v60 }
 0x277   : > { %v833_v62 = vpop.eup %832 }
 0x278   : > { %v513_v0 = vmul.f32 %v833_v62, %v507_v61 }
 0x27a   : > { %v514_v1 = vpack.c.bf16 %v513_v0, %v512_v63 }
 0x27c   : > { %793 = vmatmul.mubr.bf16.vlgmr.msra.gmra.mrb[4].mxu0 %v514_v1 }
 0x34f   : > { %v620_v3 = vpop.f32.mrb[4].mxu0 }
 0x350   : > { %v621_v4 = vadd.f32 %v710_v2, %v620_v3  ;;  %v794_v5 = vpop.f32.mrb[5].mxu0 }
 0x351   : > { %v623_v6 = vpop.f32.mrb[6].mxu0 }
 0x352   : > { %628 = vst.msk [vmem:[%s280_s16] sm:$0xff] %vm627_vm2, %v621_v4  ;;  %v624_v7 = vadd.f32 %v710_v2, %v623_v6  ;;  %v795_v8 = vpop.f32.mrb[7].mxu0 }
 0x354   : > { %629 = vst.msk [vmem:[%s280_s16 + $0x8] sm:$0xff] %vm627_vm2, %v624_v7 }
 0x355 PF: > { %s17_s24 = sadd.s32 1, %s840_s24  }
 0x356   : > { %p14_p4 = scmp.ge.s32.totalorder %s17_s24, 4  }
 0x358   :  { %16 = sbr.rel (!%p14_p4) target bundleno = 1 (0x1), region = 78 }

</bundles_post_ra>
